<compile_context>
chip_gen: v7x
topology: tpu7x:2x2x1
jax: 0.10.0
libtpu: 0.0.40
codegen_flags: <defaults>
</compile_context>

<pallas_src>
import functools

import jax
import jax.numpy as jnp
from jax import lax
from jax.experimental import pallas as pl
from jax.experimental.pallas import tpu as pltpu

_LANES = 128


def value_net_kernel(xT_ref, w1_ref, b1_ref, w2_ref, b2_ref, out_ref):
    # xT_ref : [S, TB]   state features on sublanes, batch on lanes
    # w1_ref : [H, S]    fc1 weight in torch [out, in] layout
    # b1_ref : [H, 1]    fc1 bias as a column
    # w2_ref : [H, 1]    fc2 weight as a column
    # b2_ref : [1, 1]    fc2 bias (SMEM scalar)
    # out_ref: [1, TB]   lane-dense values for this batch tile
    S = xT_ref.shape[0]
    tb = xT_ref.shape[1]
    n_chunks = tb // _LANES                      # static

    # Hoist the (tiny) parameter loads once per grid step.  The per-chunk
    # lane/sublane broadcasts stay inside the chunk loop so the live vreg set
    # per chunk is ~[128, 128] = 16 vregs and never spills.
    w1 = w1_ref[...]                             # [H, S]
    b1 = b1_ref[...]                             # [H, 1]
    w2 = w2_ref[...]                             # [H, 1]
    b2 = b2_ref[0, 0]                            # scalar from SMEM

    def chunk(c, carry):
        off = pl.multiple_of(c * _LANES, _LANES)
        xc = xT_ref[:, pl.ds(off, _LANES)]       # [S, 128]
        # fc1 on the VPU: h[j, b] = b1[j] + sum_k w1[j, k] * x[b, k]
        h = b1 + w1[:, 0:1] * xc[0:1, :]         # [H, 128]
        for k in range(1, S):                    # S is static (= 4)
            h = h + w1[:, k:k + 1] * xc[k:k + 1, :]
        h = jnp.maximum(h, 0.0)                  # ReLU
        # fc2: VPU multiply + sublane (XLU) reduction -> [1, 128]
        v = jnp.sum(h * w2, axis=0, keepdims=True) + b2
        out_ref[:, pl.ds(off, _LANES)] = v.astype(out_ref.dtype)
        return carry

    lax.fori_loop(0, n_chunks, chunk, 0, unroll=True)


def _round_up(n, m):
    return ((n + m - 1) // m) * m


def _tensorcores_per_chip():
    """Best-effort detection; safe fallback is 1 TensorCore per chip."""
    try:
        kind = jax.devices()[0].device_kind.lower()
    except Exception:
        return 1
    # v7x (and v4 megacore) expose two TensorCores behind one device; the
    # "parallel" grid axis shards across them.  v5e/v6e have a single TC.
    return 2 if ("v7" in kind or "7x" in kind or "v4" in kind) else 1


@functools.partial(jax.jit, static_argnames=("max_tile",))
def value_net(x, w1, b1, w2, b2, *, max_tile=2048):
    """x: [B, state_dim] f32 -> [B, 1] f32  (== fc2(relu(fc1(x))))."""
    B, S = x.shape
    H = w1.shape[0]

    # Batch tile: one big tile (grid=1) on single-TC chips; on 2-TC chips aim
    # for two evenly sized grid steps.  Capped so the in-kernel chunk unroll
    # stays modest; per-step VMEM footprint is ~KBs on every generation.
    num_tc = _tensorcores_per_chip()
    target = pl.cdiv(B, num_tc) if num_tc > 1 else B
    tb = min(max_tile, _round_up(max(target, 1), _LANES))
    b_pad = _round_up(B, tb)

    # Layout plumbing (fused under jit): pad the batch to a tile multiple and
    # put it on the lane axis (features on sublanes).
    xT = jnp.pad(x, ((0, b_pad - B), (0, 0))).T            # [S, B_pad]

    out = pl.pallas_call(
        value_net_kernel,
        out_shape=jax.ShapeDtypeStruct((1, b_pad), jnp.float32),
        grid=(b_pad // tb,),
        in_specs=[
            pl.BlockSpec((S, tb), lambda i: (0, i)),        # x^T batch tile
            pl.BlockSpec((H, S), lambda i: (0, 0)),         # w1 (VMEM-resident)
            pl.BlockSpec((H, 1), lambda i: (0, 0)),         # b1
            pl.BlockSpec((H, 1), lambda i: (0, 0)),         # w2
            pl.BlockSpec(memory_space=pltpu.MemorySpace.SMEM),  # b2 scalar
        ],
        out_specs=pl.BlockSpec((1, tb), lambda i: (0, i)),
        compiler_params=pltpu.CompilerParams(
            dimension_semantics=("parallel",)),
    )(xT, w1, b1, w2, b2)

    return out[0, :B].reshape(B, 1)


def init_params(key, state_dim, hidden_dim):
    """Deterministic PyTorch-style (uniform fan-in) initialization."""
    k1, k2, k3, k4 = jax.random.split(key, 4)
    bound1 = 1.0 / jnp.sqrt(state_dim)
    bound2 = 1.0 / jnp.sqrt(hidden_dim)
    # fc1 weight in torch [out, in] layout; biases / fc2 weight as columns.
    w1 = jax.random.uniform(k1, (hidden_dim, state_dim), jnp.float32,
                            -bound1, bound1)
    b1 = jax.random.uniform(k2, (hidden_dim, 1), jnp.float32, -bound1, bound1)
    w2 = jax.random.uniform(k3, (hidden_dim, 1), jnp.float32, -bound2, bound2)
    b2 = jax.random.uniform(k4, (1, 1), jnp.float32, -bound2, bound2)
    return w1, b1, w2, b2


def _reference(x, w1, b1, w2, b2):
    h = jnp.maximum(x @ w1.T + b1.T, 0.0)
    return h @ w2 + b2[0, 0]


if __name__ == "__main__":
    state_dim = 4      # CartPole-v1 observation dim
    hidden_dim = 128

    key = jax.random.PRNGKey(0)
    kx, kp, kx2 = jax.random.split(key, 3)
    w1, b1, w2, b2 = init_params(kp, state_dim, hidden_dim)

    # Small batch (typical AC rollout minibatch).
    x = jax.random.normal(kx, (8, state_dim), jnp.float32)
    out = jax.block_until_ready(value_net(x, w1, b1, w2, b2))
    ref = _reference(x, w1, b1, w2, b2)
    assert out.shape == (8, 1)
    assert jnp.allclose(out, ref, atol=1e-5), "mismatch vs reference (B=8)"

    # Larger, non-tile-multiple batch: exercises the multi-chunk inner loop,
    # the (possibly multi-step) parallel grid, and the zero-padded tail.
    x2 = jax.random.normal(kx2, (1000, state_dim), jnp.float32)
    out2 = jax.block_until_ready(value_net(x2, w1, b1, w2, b2))
    ref2 = _reference(x2, w1, b1, w2, b2)
    assert out2.shape == (1000, 1)
    assert jnp.allclose(out2, ref2, atol=1e-5), "mismatch vs reference (B=1000)"

    print("KERNEL_OK")
</pallas_src>

<mosaic_0001>
module attributes {stable_mosaic.version = 11 : i64} {
  func.func @value_net_kernel(%arg0: i32, %arg1: memref<4x128xf32, #tpu.memory_space<vmem>>, %arg2: memref<128x4xf32, #tpu.memory_space<vmem>>, %arg3: memref<128x1xf32, #tpu.memory_space<vmem>>, %arg4: memref<128x1xf32, #tpu.memory_space<vmem>>, %arg5: memref<1x1xf32, #tpu.memory_space<smem>>, %arg6: memref<1x128xf32, #tpu.memory_space<vmem>>) attributes {dimension_semantics = [#tpu.dimension_semantics<parallel>], iteration_bounds = array<i64: 1>, scalar_prefetch = 0 : i64, scratch_operands = 0 : i64, tpu.core_type = #tpu.core_type<tc>, window_params = [{transform_indices = @transform_0, window_bounds = array<i64: 4, 128>}, {pipeline_mode = #tpu.pipeline_mode<synchronous>, transform_indices = @transform_1, window_bounds = array<i64: 128, 4>}, {pipeline_mode = #tpu.pipeline_mode<synchronous>, transform_indices = @transform_2, window_bounds = array<i64: 128, 1>}, {pipeline_mode = #tpu.pipeline_mode<synchronous>, transform_indices = @transform_3, window_bounds = array<i64: 128, 1>}, {transform_indices = @transform_4, window_bounds = array<i64: 1, 1>}, {transform_indices = @transform_5, window_bounds = array<i64: 1, 128>}]} {
    %c0 = arith.constant 0 : index
    %c0_0 = arith.constant 0 : index
    %0 = vector.load %arg2[%c0, %c0_0] : memref<128x4xf32, #tpu.memory_space<vmem>>, vector<128x4xf32>
    %c0_1 = arith.constant 0 : index
    %c0_2 = arith.constant 0 : index
    %1 = vector.load %arg3[%c0_1, %c0_2] : memref<128x1xf32, #tpu.memory_space<vmem>>, vector<128x1xf32>
    %c0_3 = arith.constant 0 : index
    %c0_4 = arith.constant 0 : index
    %2 = vector.load %arg4[%c0_3, %c0_4] : memref<128x1xf32, #tpu.memory_space<vmem>>, vector<128x1xf32>
    %c0_5 = arith.constant 0 : index
    %c0_6 = arith.constant 0 : index
    %3 = memref.load %arg5[%c0_5, %c0_6] : memref<1x1xf32, #tpu.memory_space<smem>>
    %c0_i32 = arith.constant 0 : i32
    %c128_i32 = arith.constant 128 : i32
    %4 = arith.muli %c0_i32, %c128_i32 : i32
    %5 = tpu.assume_multiple %4, 128 : i32
    %c0_7 = arith.constant 0 : index
    %6 = arith.index_cast %5 : i32 to index
    %7 = vector.load %arg1[%c0_7, %6] : memref<4x128xf32, #tpu.memory_space<vmem>>, vector<4x128xf32>
    %8 = vector.extract_strided_slice %0 {offsets = [0, 0], sizes = [128, 1], strides = [1, 1]} : vector<128x4xf32> to vector<128x1xf32>
    %9 = vector.extract_strided_slice %7 {offsets = [0, 0], sizes = [1, 128], strides = [1, 1]} : vector<4x128xf32> to vector<1x128xf32>
    %10 = vector.broadcast %8 : vector<128x1xf32> to vector<128x128xf32>
    %11 = vector.broadcast %9 : vector<1x128xf32> to vector<128x128xf32>
    %12 = arith.mulf %10, %11 : vector<128x128xf32>
    %13 = vector.broadcast %1 : vector<128x1xf32> to vector<128x128xf32>
    %14 = arith.addf %13, %12 : vector<128x128xf32>
    %15 = vector.extract_strided_slice %0 {offsets = [0, 1], sizes = [128, 1], strides = [1, 1]} : vector<128x4xf32> to vector<128x1xf32>
    %16 = vector.extract_strided_slice %7 {offsets = [1, 0], sizes = [1, 128], strides = [1, 1]} : vector<4x128xf32> to vector<1x128xf32>
    %17 = vector.broadcast %15 : vector<128x1xf32> to vector<128x128xf32>
    %18 = vector.broadcast %16 : vector<1x128xf32> to vector<128x128xf32>
    %19 = arith.mulf %17, %18 : vector<128x128xf32>
    %20 = arith.addf %14, %19 : vector<128x128xf32>
    %21 = vector.extract_strided_slice %0 {offsets = [0, 2], sizes = [128, 1], strides = [1, 1]} : vector<128x4xf32> to vector<128x1xf32>
    %22 = vector.extract_strided_slice %7 {offsets = [2, 0], sizes = [1, 128], strides = [1, 1]} : vector<4x128xf32> to vector<1x128xf32>
    %23 = vector.broadcast %21 : vector<128x1xf32> to vector<128x128xf32>
    %24 = vector.broadcast %22 : vector<1x128xf32> to vector<128x128xf32>
    %25 = arith.mulf %23, %24 : vector<128x128xf32>
    %26 = arith.addf %20, %25 : vector<128x128xf32>
    %27 = vector.extract_strided_slice %0 {offsets = [0, 3], sizes = [128, 1], strides = [1, 1]} : vector<128x4xf32> to vector<128x1xf32>
    %28 = vector.extract_strided_slice %7 {offsets = [3, 0], sizes = [1, 128], strides = [1, 1]} : vector<4x128xf32> to vector<1x128xf32>
    %29 = vector.broadcast %27 : vector<128x1xf32> to vector<128x128xf32>
    %30 = vector.broadcast %28 : vector<1x128xf32> to vector<128x128xf32>
    %31 = arith.mulf %29, %30 : vector<128x128xf32>
    %32 = arith.addf %26, %31 : vector<128x128xf32>
    %cst = arith.constant 0.000000e+00 : f32
    %33 = vector.broadcast %cst : f32 to vector<128x128xf32>
    %34 = arith.maximumf %32, %33 : vector<128x128xf32>
    %35 = vector.broadcast %2 : vector<128x1xf32> to vector<128x128xf32>
    %36 = arith.mulf %34, %35 : vector<128x128xf32>
    %cst_8 = arith.constant dense<0.000000e+00> : vector<128xf32>
    %37 = vector.multi_reduction <add>, %36, %cst_8 [0] : vector<128x128xf32> to vector<128xf32>
    %38 = vector.shape_cast %37 : vector<128xf32> to vector<1x128xf32>
    %39 = vector.broadcast %3 : f32 to vector<1x128xf32>
    %40 = arith.addf %38, %39 : vector<1x128xf32>
    %c0_9 = arith.constant 0 : index
    %41 = arith.index_cast %5 : i32 to index
    %42 = vector.load %arg6[%c0_9, %41] : memref<1x128xf32, #tpu.memory_space<vmem>>, vector<1x128xf32>
    tpu.vector_store %arg6[%c0_9, %41], %40 {strides = array<i32>} : memref<1x128xf32, #tpu.memory_space<vmem>>, vector<1x128xf32>,
    %c1_i32 = arith.constant 1 : i32
    return
  }
  func.func @transform_0(%arg0: i32) -> (i32, i32) {
    %c0_i32 = arith.constant 0 : i32
    %c0_i32_0 = arith.constant 0 : i32
    return %c0_i32, %arg0 : i32, i32
  }
  func.func @transform_1(%arg0: i32) -> (i32, i32) {
    %c0_i32 = arith.constant 0 : i32
    %c0_i32_0 = arith.constant 0 : i32
    %c0_i32_1 = arith.constant 0 : i32
    return %c0_i32, %c0_i32_0 : i32, i32
  }
  func.func @transform_2(%arg0: i32) -> (i32, i32) {
    %c0_i32 = arith.constant 0 : i32
    %c0_i32_0 = arith.constant 0 : i32
    %c0_i32_1 = arith.constant 0 : i32
    return %c0_i32, %c0_i32_0 : i32, i32
  }
  func.func @transform_3(%arg0: i32) -> (i32, i32) {
    %c0_i32 = arith.constant 0 : i32
    %c0_i32_0 = arith.constant 0 : i32
    %c0_i32_1 = arith.constant 0 : i32
    return %c0_i32, %c0_i32_0 : i32, i32
  }
  func.func @transform_4(%arg0: i32) -> (i32, i32) {
    %c0_i32 = arith.constant 0 : i32
    %c0_i32_0 = arith.constant 0 : i32
    %c0_i32_1 = arith.constant 0 : i32
    return %c0_i32, %c0_i32_0 : i32, i32
  }
  func.func @transform_5(%arg0: i32) -> (i32, i32) {
    %c0_i32 = arith.constant 0 : i32
    %c0_i32_0 = arith.constant 0 : i32
    return %c0_i32, %arg0 : i32, i32
  }
}

</mosaic_0001>

<bundles_post_ra>
// kernel: value_net.1
= control target key start
LH: loop header
LB: loop body
LE: loop exit
PB: predicated region body
PF: predicated region fallthrough
CT: control target
= control target key end

     0   :  { %v722_v0 = vmov 1   ;;  %v723_v1 = vmov 0   ;;  %v724_v13 = vmov 2   ;;  %v725_v27 = vmov 3   ;;  %s1221_s1 = inlined_call_operand.vmem [shape: f32[128,4], index: 1, kind: input, shape index: {}]   ;;  %s1222_s2 = inlined_call_operand.vmem [shape: f32[128,1], index: 2, kind: input, shape index: {}]   ;;  %s1223_s3 = inlined_call_operand.vmem [shape: f32[128,1], index: 3, kind: input, shape index: {}]   ;;  %s1224_s0 = inlined_call_operand.vmem [shape: f32[4,128], index: 0, kind: input, shape index: {}]   ;;  %s1225_s4 = inlined_call_operand.<no memory space> [shape: f32[1,1], index: 4, kind: input, shape index: {}]   ;;  %s1226_s5 = inlined_call_operand.vmem [shape: f32[1,128], index: 5, kind: output, shape index: {}]  }
   0x1   :  { %712 = vset.pattern.permute.xlu0 %v722_v0  ;;  %711 = vset.pattern.permute.xlu1 %v723_v1  ;;  %v761_v2 = vld [vmem:[%s1221_s1 + $0x10] sm:$0xff]  ;;  %v766_v3 = vld [vmem:[%s1221_s1] sm:$0xff]  ;;  %v773_v4 = vld [vmem:[%s1221_s1 + $0x18] sm:$0xff]  ;;  %v151_v53 = vlaneseq }
   0x2   :  { %83 = vperm.xlu1 %711, %v761_v2   ;;  %268 = vperm.xlu0 %712, %v766_v3   ;;  %v780_v5 = vld [vmem:[%s1221_s1 + $0x28] sm:$0xff]  ;;  %v787_v6 = vld [vmem:[%s1221_s1 + $0x38] sm:$0xff]  ;;  %v834_v15 = vld [vmem:[%s1221_s1 + $0x20] sm:$0xff] }
   0x3   :  { %v794_v7 = vld [vmem:[%s1221_s1 + $0x48] sm:$0xff]  ;;  %v801_v8 = vld [vmem:[%s1221_s1 + $0x58] sm:$0xff]  ;;  %v843_v17 = vld [vmem:[%s1221_s1 + $0x30] sm:$0xff]  ;;  %v976_v57 = vshrl.u32 %v151_v53, 7 }
   0x4   :  { %v808_v9 = vld [vmem:[%s1221_s1 + $0x68] sm:$0xff]  ;;  %v815_v10 = vld [vmem:[%s1221_s1 + $0x78] sm:$0xff]  ;;  %v852_v19 = vld [vmem:[%s1221_s1 + $0x40] sm:$0xff] }
   0x5   :  { %v38_v11 = vld [vmem:[%s1222_s2 + $0x8] sm:$0xff]  ;;  %v40_v14 = vld [vmem:[%s1222_s2 + $0x18] sm:$0xff]  ;;  %v861_v21 = vld [vmem:[%s1221_s1 + $0x50] sm:$0xff]  ;;  %v153_v61 = vsub.s32 0, %v976_v57  ;;  %v333_v62 = vsub.s32 1, %v976_v57 }
   0x6   :  { %88 = vperm.xlu1 %711, %v773_v4   ;;  %280 = vperm.xlu0 %712, %v773_v4   ;;  %v825_v12 = vld [vmem:[%s1221_s1 + $0x8] sm:$0xff]  ;;  %v44_v18 = vld [vmem:[%s1222_s2 + $0x38] sm:$0xff]  ;;  %v870_v23 = vld [vmem:[%s1221_s1 + $0x60] sm:$0xff] }
   0x7   :  { %v42_v16 = vld [vmem:[%s1222_s2 + $0x28] sm:$0xff]  ;;  %v48_v22 = vld [vmem:[%s1222_s2 + $0x58] sm:$0xff]  ;;  %v879_v25 = vld [vmem:[%s1221_s1 + $0x70] sm:$0xff] }
   0x8   :  { %v46_v20 = vld [vmem:[%s1222_s2 + $0x48] sm:$0xff]  ;;  %v52_v26 = vld [vmem:[%s1222_s2 + $0x78] sm:$0xff]  ;;  %v37_v28 = vld [vmem:[%s1222_s2] sm:$0xff] }
   0x9   :  { %v50_v24 = vld [vmem:[%s1222_s2 + $0x68] sm:$0xff]  ;;  %v39_v29 = vld [vmem:[%s1222_s2 + $0x10] sm:$0xff]  ;;  %v41_v30 = vld [vmem:[%s1222_s2 + $0x20] sm:$0xff] }
   0xa   :  { %98 = vperm.xlu1 %711, %v780_v5   ;;  %288 = vperm.xlu0 %712, %v780_v5   ;;  %v43_v31 = vld [vmem:[%s1222_s2 + $0x30] sm:$0xff]  ;;  %v45_v32 = vld [vmem:[%s1222_s2 + $0x40] sm:$0xff]  ;;  %v56_v46 = vld [vmem:[%s1223_s3 + $0x18] sm:$0xff] }
   0xb   :  { %v47_v33 = vld [vmem:[%s1222_s2 + $0x50] sm:$0xff]  ;;  %v49_v34 = vld [vmem:[%s1222_s2 + $0x60] sm:$0xff]  ;;  %v54_v50 = vld [vmem:[%s1223_s3 + $0x8] sm:$0xff] }
   0xc   :  { %v51_v37 = vld [vmem:[%s1222_s2 + $0x70] sm:$0xff]  ;;  %v53_v40 = vld [vmem:[%s1223_s3] sm:$0xff]  ;;  %v58_v54 = vld [vmem:[%s1223_s3 + $0x28] sm:$0xff] }
   0xd   :  { %v55_v43 = vld [vmem:[%s1223_s3 + $0x10] sm:$0xff]  ;;  %v57_v49 = vld [vmem:[%s1223_s3 + $0x20] sm:$0xff]  ;;  %v60_v63 = vld [vmem:[%s1223_s3 + $0x38] sm:$0xff] }
   0xe   :  { %108 = vperm.xlu1 %711, %v787_v6   ;;  %296 = vperm.xlu0 %712, %v787_v6   ;;  %v59_v58 = vld [vmem:[%s1223_s3 + $0x30] sm:$0xff] }
  0x12   :  { %118 = vperm.xlu1 %711, %v794_v7   ;;  %304 = vperm.xlu0 %712, %v794_v7  }
  0x16   :  { %128 = vperm.xlu1 %711, %v801_v8   ;;  %312 = vperm.xlu0 %712, %v801_v8  }
  0x1a   :  { %138 = vperm.xlu1 %711, %v808_v9   ;;  %320 = vperm.xlu0 %712, %v808_v9  }
  0x1e   :  { %148 = vperm.xlu1 %711, %v815_v10   ;;  %328 = vperm.xlu0 %712, %v815_v10  }
  0x22   :  { %178 = vperm.xlu1 %711, %v38_v11   ;;  %715 = vset.pattern.permute.xlu0 %v724_v13  ;;  %v61_v11 = vld [vmem:[%s1223_s3 + $0x40] sm:$0xff] }
  0x23   :  { %372 = vperm.xlu0 %715, %v825_v12  }
  0x26   :  { %188 = vperm.xlu1 %711, %v40_v14  }
  0x27   :  { %384 = vperm.xlu0 %715, %v834_v15  }
  0x2a   :  { %198 = vperm.xlu1 %711, %v42_v16  }
  0x2b   :  { %392 = vperm.xlu0 %715, %v843_v17  }
  0x2e   :  { %208 = vperm.xlu1 %711, %v44_v18  }
  0x2f   :  { %400 = vperm.xlu0 %715, %v852_v19  }
  0x32   :  { %218 = vperm.xlu1 %711, %v46_v20  }
  0x33   :  { %408 = vperm.xlu0 %715, %v861_v21  }
  0x36   :  { %228 = vperm.xlu1 %711, %v48_v22  }
  0x37   :  { %416 = vperm.xlu0 %715, %v870_v23  }
  0x3a   :  { %238 = vperm.xlu1 %711, %v50_v24  }
  0x3b   :  { %424 = vperm.xlu0 %715, %v879_v25  }
  0x3e   :  { %248 = vperm.xlu1 %711, %v52_v26  }
  0x3f   :  { %716 = vset.pattern.permute.xlu0 %v725_v27 }
  0x40   :  { %468 = vperm.xlu0 %716, %v766_v3  }
  0x42   :  { %713 = vset.pattern.permute.xlu1 %v722_v0  ;;  %v995_v0 = vld [vmem:[%s1224_s0] sm:$0xf] }
  0x43   :  { %272 = vperm.xlu1 %713, %v825_v12  }
  0x44   :  { %480 = vperm.xlu0 %716, %v773_v4  }
  0x47   :  { %276 = vperm.xlu1 %713, %v761_v2  }
  0x48   :  { %718 = vset.pattern.permute.xlu0 %v723_v1 }
  0x49   :  { %73 = vperm.xlu0 %718, %v766_v3  }
  0x4b   :  { %284 = vperm.xlu1 %713, %v834_v15  }
  0x4d   :  { %78 = vperm.xlu0 %718, %v825_v12  }
  0x4f   :  { %292 = vperm.xlu1 %713, %v843_v17  }
  0x51   :  { %93 = vperm.xlu0 %718, %v834_v15  }
  0x53   :  { %300 = vperm.xlu1 %713, %v852_v19  }
  0x55   :  { %103 = vperm.xlu0 %718, %v843_v17  }
  0x57   :  { %308 = vperm.xlu1 %713, %v861_v21  }
  0x59   :  { %113 = vperm.xlu0 %718, %v852_v19  }
  0x5b   :  { %316 = vperm.xlu1 %713, %v870_v23  }
  0x5d   :  { %123 = vperm.xlu0 %718, %v861_v21  }
  0x5f   :  { %324 = vperm.xlu1 %713, %v879_v25  }
  0x61   :  { %133 = vperm.xlu0 %718, %v870_v23  }
  0x63   :  { %714 = vset.pattern.permute.xlu1 %v724_v13 }
  0x64   :  { %368 = vperm.xlu1 %714, %v766_v3   ;;  %v1001_v3 = vrot.slane %v995_v0, %v153_v61 }
  0x65   :  { %143 = vperm.xlu0 %718, %v879_v25  }
  0x68   :  { %376 = vperm.xlu1 %714, %v761_v2  }
  0x69   :  { %173 = vperm.xlu0 %718, %v37_v28  }
  0x6c   :  { %380 = vperm.xlu1 %714, %v773_v4   ;;  %v1004_v4 = vrot.slane %v995_v0, %v333_v62 }
  0x6d   :  { %183 = vperm.xlu0 %718, %v39_v29  }
  0x70   :  { %388 = vperm.xlu1 %714, %v780_v5  }
  0x71   :  { %193 = vperm.xlu0 %718, %v41_v30  }
  0x74   :  { %396 = vperm.xlu1 %714, %v787_v6  }
  0x75   :  { %203 = vperm.xlu0 %718, %v43_v31  }
  0x78   :  { %404 = vperm.xlu1 %714, %v794_v7  }
  0x79   :  { %213 = vperm.xlu0 %718, %v45_v32  }
  0x7c   :  { %412 = vperm.xlu1 %714, %v801_v8  }
  0x7d   :  { %223 = vperm.xlu0 %718, %v47_v33   ;;  %v64_v33 = vld [vmem:[%s1223_s3 + $0x58] sm:$0xff] }
  0x80   :  { %420 = vperm.xlu1 %714, %v808_v9  }
  0x81   :  { %v935_v35 = vpop.permute.xlu1 %83  ;;  %233 = vperm.xlu0 %718, %v49_v34   ;;  %v937_v36 = vpop.permute.xlu0 %268 }
  0x84   :  { %428 = vperm.xlu1 %714, %v815_v10  }
  0x85   :  { %v89_v38 = vpop.permute.xlu1 %88  ;;  %243 = vperm.xlu0 %718, %v51_v37   ;;  %v281_v39 = vpop.permute.xlu0 %280 }
  0x86   :  { %v338_v14 = vmul.f32 %v1004_v4, %v281_v39 }
  0x88   :  { %717 = vset.pattern.permute.xlu1 %v725_v27 }
  0x89   :  { %v99_v41 = vpop.permute.xlu1 %98  ;;  %472 = vperm.xlu1 %717, %v825_v12   ;;  %585 = vperm.xlu0 %718, %v53_v40   ;;  %v289_v42 = vpop.permute.xlu0 %288  ;;  %v158_v12 = vmul.f32 %v1001_v3, %v89_v38 }
  0x8a   :  { %v160_v18 = vmul.f32 %v1001_v3, %v99_v41  ;;  %v340_v22 = vmul.f32 %v1004_v4, %v289_v42  ;;  %v65_v41 = vld [vmem:[%s1223_s3 + $0x60] sm:$0xff] }
  0x8d   :  { %v109_v44 = vpop.permute.xlu1 %108  ;;  %476 = vperm.xlu1 %717, %v761_v2   ;;  %595 = vperm.xlu0 %718, %v55_v43   ;;  %v297_v45 = vpop.permute.xlu0 %296 }
  0x8e   :  { %v162_v28 = vmul.f32 %v1001_v3, %v109_v44  ;;  %v342_v30 = vmul.f32 %v1004_v4, %v297_v45 }
  0x91   :  { %v119_v47 = vpop.permute.xlu1 %118  ;;  %484 = vperm.xlu1 %717, %v834_v15   ;;  %600 = vperm.xlu0 %718, %v56_v46   ;;  %v956_v48 = vpop.permute.xlu0 %304 }
  0x92   :  { %v164_v34 = vmul.f32 %v1001_v3, %v119_v47  ;;  %v344_v38 = vmul.f32 %v1004_v4, %v956_v48  ;;  %v67_v47 = vld [vmem:[%s1223_s3 + $0x70] sm:$0xff] }
  0x95   :  { %v964_v51 = vpop.permute.xlu1 %128  ;;  %719 = vset.pattern.permute.xlu1 %v723_v1  ;;  %605 = vperm.xlu0 %718, %v57_v49   ;;  %v967_v52 = vpop.permute.xlu0 %312 }
  0x96   :  { %590 = vperm.xlu1 %719, %v54_v50   ;;  %v346_v44 = vmul.f32 %v1004_v4, %v967_v52 }
  0x99   :  { %v972_v55 = vpop.permute.xlu1 %138  ;;  %610 = vperm.xlu0 %718, %v58_v54   ;;  %v974_v56 = vpop.permute.xlu0 %320 }
  0x9a   :  { %720 = vset.pattern.permute.xlu1 %v725_v27  ;;  %v63_v27 = vld [vmem:[%s1223_s3 + $0x50] sm:$0xff]  ;;  %v348_v50 = vmul.f32 %v1004_v4, %v974_v56 }
  0x9b   :  { %488 = vperm.xlu1 %720, %v780_v5  }
  0x9d   :  { %v983_v59 = vpop.permute.xlu1 %148  ;;  %615 = vperm.xlu0 %718, %v59_v58   ;;  %v985_v60 = vpop.permute.xlu0 %328 }
  0x9e   :  { %v170_v53 = vmul.f32 %v1001_v3, %v983_v59 }
  0x9f   :  { %492 = vperm.xlu1 %720, %v843_v17   ;;  %v62_v17 = vld [vmem:[%s1223_s3 + $0x48] sm:$0xff] }
  0xa1   :  { %v998_v2 = vpop.permute.xlu1 %178  ;;  %620 = vperm.xlu0 %718, %v60_v63  }
  0xa2   :  { %v1006_v5 = vpop.permute.xlu0 %372 }
  0xa3   :  { %496 = vperm.xlu1 %720, %v787_v6  }
  0xa5   :  { %v189_v13 = vpop.permute.xlu1 %188  ;;  %625 = vperm.xlu0 %718, %v61_v11   ;;  %v433_v11 = vsub.s32 2, %v976_v57 }
  0xa6   :  { %v254_v15 = vadd.f32 %v189_v13, %v158_v12  ;;  %v1014_v16 = vpop.permute.xlu0 %384 }
  0xa7   :  { %500 = vperm.xlu1 %720, %v852_v19   ;;  %v1093_v13 = vrot.slane %v995_v0, %v433_v11 }
  0xa8   :  { %v1021_v20 = vadd.f32 %v338_v14, %v254_v15 }
  0xa9   :  { %v199_v6 = vpop.permute.xlu1 %198  ;;  %630 = vperm.xlu0 %718, %v62_v17  }
  0xaa   :  { %v256_v24 = vadd.f32 %v199_v6, %v160_v18  ;;  %v1024_v26 = vpop.permute.xlu0 %392  ;;  %v436_v6 = vmul.f32 %v1093_v13, %v1006_v5 }
  0xab   :  { %504 = vperm.xlu1 %720, %v794_v7  }
  0xac   :  { %v1031_v19 = vadd.f32 %v340_v22, %v256_v24 }
  0xad   :  { %v209_v29 = vpop.permute.xlu1 %208  ;;  %635 = vperm.xlu0 %718, %v63_v27  }
  0xae   :  { %v258_v31 = vadd.f32 %v209_v29, %v162_v28  ;;  %v1034_v32 = vpop.permute.xlu0 %400 }
  0xaf   :  { %508 = vperm.xlu1 %720, %v861_v21   ;;  %v166_v21 = vmul.f32 %v1001_v3, %v964_v51 }
  0xb0   :  { %v1041_v7 = vadd.f32 %v342_v30, %v258_v31 }
  0xb1   :  { %v219_v37 = vpop.permute.xlu1 %218  ;;  %640 = vperm.xlu0 %718, %v64_v33  }
  0xb2   :  { %v260_v39 = vadd.f32 %v219_v37, %v164_v34  ;;  %v1045_v40 = vpop.permute.xlu0 %408 }
  0xb3   :  { %512 = vperm.xlu1 %720, %v801_v8   ;;  %v168_v8 = vmul.f32 %v1001_v3, %v972_v55  ;;  %v350_v55 = vmul.f32 %v1004_v4, %v985_v60 }
  0xb4   :  { %v1053_v42 = vadd.f32 %v344_v38, %v260_v39 }
  0xb5   :  { %v229_v43 = vpop.permute.xlu1 %228  ;;  %645 = vperm.xlu0 %718, %v65_v41  }
  0xb6   :  { %v262_v45 = vadd.f32 %v229_v43, %v166_v21  ;;  %v1057_v46 = vpop.permute.xlu0 %416  ;;  %v335_v43 = vmul.f32 %v1004_v4, %v937_v36 }
  0xb7   :  { %516 = vperm.xlu1 %720, %v870_v23  }
  0xb8   :  { %v1065_v48 = vadd.f32 %v346_v44, %v262_v45 }
  0xb9   :  { %v239_v49 = vpop.permute.xlu1 %238  ;;  %655 = vperm.xlu0 %718, %v67_v47  }
  0xba   :  { %v264_v51 = vadd.f32 %v239_v49, %v168_v8  ;;  %v1069_v52 = vpop.permute.xlu0 %424 }
  0xbb   :  { %520 = vperm.xlu1 %720, %v808_v9   ;;  %v66_v9 = vld [vmem:[%s1223_s3 + $0x68] sm:$0xff] }
  0xbc   :  { %v1074_v54 = vadd.f32 %v348_v50, %v264_v51 }
  0xbd   :  { %v249_v23 = vpop.permute.xlu1 %248 }
  0xbe   :  { %v266_v58 = vadd.f32 %v249_v23, %v170_v53 }
  0xbf   :  { %524 = vperm.xlu1 %720, %v879_v25   ;;  %v469_v61 = vpop.permute.xlu0 %468  ;;  %v68_v25 = vld [vmem:[%s1223_s3 + $0x78] sm:$0xff] }
  0xc0   :  { %v1079_v62 = vadd.f32 %v350_v55, %v266_v58 }
  0xc2   :  { %v273_v56 = vpop.permute.xlu1 %272 }
  0xc3   :  { %528 = vperm.xlu1 %720, %v815_v10   ;;  %v481_v63 = vpop.permute.xlu0 %480  ;;  %v336_v17 = vmul.f32 %v1004_v4, %v273_v56 }
  0xc6   :  { %v1085_v59 = vpop.permute.xlu1 %276 }
  0xc7   :  { %721 = vset.pattern.permute.xlu1 %v723_v1 }
  0xc8   :  { %650 = vperm.xlu1 %721, %v66_v9   ;;  %v74_v60 = vpop.permute.xlu0 %73 }
  0xc9   :  { %v155_v41 = vmul.f32 %v1001_v3, %v74_v60 }
  0xca   :  { %v285_v12 = vpop.permute.xlu1 %284 }
  0xcb   :  { %v339_v60 = vmul.f32 %v1004_v4, %v285_v12 }
  0xcc   :  { %660 = vperm.xlu1 %721, %v68_v25   ;;  %v79_v10 = vpop.permute.xlu0 %78 }
  0xcd   :  { %v156_v14 = vmul.f32 %v1001_v3, %v79_v10 }
  0xce   :  { %v293_v15 = vpop.permute.xlu1 %292 }
  0xcf   :  { %v252_v1 = vadd.f32 %v998_v2, %v156_v14  ;;  %v533_v2 = vsub.s32 3, %v976_v57  ;;  %v341_v14 = vmul.f32 %v1004_v4, %v293_v15 }
  0xd0   :  { %v94_v18 = vpop.permute.xlu0 %93 }
  0xd1   :  { %v352_v22 = vadd.f32 %v336_v17, %v252_v1  ;;  %v1111_v44 = vrot.slane %v995_v0, %v533_v2  ;;  %v159_v36 = vmul.f32 %v1001_v3, %v94_v18  ;;  %v441_v18 = vmul.f32 %v1093_v13, %v1024_v26 }
  0xd2   :  { %v301_v24 = vpop.permute.xlu1 %300 }
  0xd3   :  { %v1100_v27 = vadd.f32 %v436_v6, %v352_v22  ;;  %v535_v57 = vmul.f32 %v1111_v44, %v469_v61  ;;  %v538_v23 = vmul.f32 %v1111_v44, %v481_v63  ;;  %v439_v61 = vmul.f32 %v1093_v13, %v1014_v16 }
  0xd4   :  { %v104_v28 = vpop.permute.xlu0 %103  ;;  %v343_v16 = vmul.f32 %v1004_v4, %v301_v24  ;;  %v445_v24 = vmul.f32 %v1093_v13, %v1045_v40  ;;  %v157_v40 = vmul.f32 %v1001_v3, %v935_v35 }
  0xd5   :  { %v161_v25 = vmul.f32 %v1001_v3, %v104_v28 }
  0xd6   :  { %v309_v29 = vpop.permute.xlu1 %308 }
  0xd8   :  { %v114_v30 = vpop.permute.xlu0 %113 }
  0xd9   :  { %v163_v6 = vmul.f32 %v1001_v3, %v114_v30  ;;  %v345_v30 = vmul.f32 %v1004_v4, %v309_v29  ;;  %v447_v29 = vmul.f32 %v1093_v13, %v1057_v46 }
  0xda   :  { %v317_v31 = vpop.permute.xlu1 %316 }
  0xdc   :  { %v124_v33 = vpop.permute.xlu0 %123 }
  0xdd   :  { %v165_v15 = vmul.f32 %v1001_v3, %v124_v33  ;;  %v347_v33 = vmul.f32 %v1004_v4, %v317_v31 }
  0xde   :  { %v1102_v34 = vpop.permute.xlu1 %324 }
  0xe0   :  { %v134_v37 = vpop.permute.xlu0 %133 }
  0xe3   :  { %v369_v38 = vpop.permute.xlu1 %368 }
  0xe4   :  { %v144_v39 = vpop.permute.xlu0 %143  ;;  %v435_v47 = vmul.f32 %v1093_v13, %v369_v38 }
  0xe7   :  { %v1106_v21 = vpop.permute.xlu1 %376 }
  0xe8   :  { %v174_v5 = vpop.permute.xlu0 %173 }
  0xe9   :  { %v251_v45 = vadd.f32 %v174_v5, %v155_v41  ;;  %v443_v41 = vmul.f32 %v1093_v13, %v1034_v32 }
  0xeb   :  { %v351_v8 = vadd.f32 %v335_v43, %v251_v45  ;;  %v381_v49 = vpop.permute.xlu1 %380 }
  0xec   :  { %v438_v50 = vmul.f32 %v1093_v13, %v381_v49  ;;  %v184_v51 = vpop.permute.xlu0 %183 }
  0xed   :  { %v451_v53 = vadd.f32 %v435_v47, %v351_v8  ;;  %v167_v8 = vmul.f32 %v1001_v3, %v134_v37 }
  0xee   :  { %v454_v55 = vadd.f32 %v438_v50, %v1021_v20 }
  0xef   :  { %v1119_v58 = vpop.permute.xlu1 %388  ;;  %v1121_v0 = vadd.f32 %v535_v57, %v451_v53 }
  0xf0   :  { %v194_v56 = vpop.permute.xlu0 %193  ;;  %v1123_v9 = vadd.f32 %v538_v23, %v454_v55  ;;  %v169_v23 = vmul.f32 %v1001_v3, %v144_v39  ;;  %v337_v39 = vmul.f32 %v1004_v4, %v1085_v59  ;;  %v437_v3 = vmul.f32 %v1093_v13, %v1106_v21 }
  0xf1   :  { %v255_v11 = vadd.f32 %v194_v56, %v159_v36  ;;  %v349_v56 = vmul.f32 %v1004_v4, %v1102_v34 }
  0xf3   :  { %v355_v63 = vadd.f32 %v339_v60, %v255_v11  ;;  %v1129_v10 = vpop.permute.xlu1 %396  ;;  %v253_v11 = vadd.f32 %v184_v51, %v157_v40 }
  0xf4   :  { %v204_v20 = vpop.permute.xlu0 %203 }
  0xf5   :  { %v257_v17 = vadd.f32 %v204_v20, %v161_v25  ;;  %v455_v1 = vadd.f32 %v439_v61, %v355_v63  ;;  %v449_v61 = vmul.f32 %v1093_v13, %v1069_v52  ;;  %v353_v35 = vadd.f32 %v337_v39, %v253_v11 }
  0xf7   :  { %v357_v12 = vadd.f32 %v341_v14, %v257_v17  ;;  %v1135_v22 = vpop.permute.xlu1 %404 }
  0xf8   :  { %v214_v38 = vpop.permute.xlu0 %213 }
  0xf9   :  { %v259_v28 = vadd.f32 %v214_v38, %v163_v6  ;;  %v1138_v2 = vadd.f32 %v441_v18, %v357_v12  ;;  %v453_v18 = vadd.f32 %v437_v3, %v353_v35  ;;  %v567_v38 = vmax.f32 %v1121_v0, 0.0 }
  0xfb   :  { %v359_v5 = vadd.f32 %v343_v16, %v259_v28  ;;  %v1143_v43 = vpop.permute.xlu1 %412 }
  0xfc   :  { %v224_v26 = vpop.permute.xlu0 %223 }
  0xfd   :  { %v261_v45 = vadd.f32 %v224_v26, %v165_v15  ;;  %v1146_v47 = vadd.f32 %v443_v41, %v359_v5 }
  0xff   :  { %v361_v49 = vadd.f32 %v345_v30, %v261_v45  ;;  %v1151_v50 = vpop.permute.xlu1 %420  ;;  %v440_v30 = vmul.f32 %v1093_v13, %v1119_v58  ;;  %v442_v58 = vmul.f32 %v1093_v13, %v1129_v10  ;;  %v444_v10 = vmul.f32 %v1093_v13, %v1135_v22 }
 0x100   :  { %v234_v32 = vpop.permute.xlu0 %233  ;;  %v446_v22 = vmul.f32 %v1093_v13, %v1143_v43 }
 0x101   :  { %v263_v57 = vadd.f32 %v234_v32, %v167_v8  ;;  %v1154_v53 = vadd.f32 %v445_v24, %v361_v49  ;;  %v456_v0 = vadd.f32 %v440_v30, %v1031_v19  ;;  %v458_v19 = vadd.f32 %v442_v58, %v1041_v7 }
 0x103   :  { %v363_v55 = vadd.f32 %v347_v33, %v263_v57  ;;  %v1159_v36 = vpop.permute.xlu1 %428 }
 0x104   :  { %v244_v37 = vpop.permute.xlu0 %243 }
 0x105   :  { %v265_v60 = vadd.f32 %v244_v37, %v169_v23  ;;  %v1165_v31 = vadd.f32 %v447_v29, %v363_v55 }
 0x107   :  { %v365_v46 = vadd.f32 %v349_v56, %v265_v60 }
 0x108   :  { %v473_v25 = vpop.permute.xlu1 %472  ;;  %v586_v63 = vpop.permute.xlu0 %585 }
 0x109   :  { %v1171_v20 = vadd.f32 %v449_v61, %v365_v46  ;;  %v536_v34 = vmul.f32 %v1111_v44, %v473_v25  ;;  %v663_v5 = vmul.f32 %v586_v63, %v567_v38 }
 0x10b   :  { %v552_v52 = vadd.f32 %v536_v34, %v1100_v27  ;;  %v570_v27 = vmax.f32 %v1123_v9, 0.0 }
 0x10c   :  { %v477_v14 = vpop.permute.xlu1 %476  ;;  %v596_v17 = vpop.permute.xlu0 %595 }
 0x10d   :  { %v537_v51 = vmul.f32 %v1111_v44, %v477_v14  ;;  %v568_v21 = vmax.f32 %v552_v52, 0.0 }
 0x10f   :  { %v553_v6 = vadd.f32 %v537_v51, %v453_v18 }
 0x110   :  { %v485_v12 = vpop.permute.xlu1 %484  ;;  %v601_v4 = vpop.permute.xlu0 %600 }
 0x111   :  { %v539_v59 = vmul.f32 %v1111_v44, %v485_v12  ;;  %v569_v16 = vmax.f32 %v553_v6, 0.0  ;;  %v666_v32 = vmul.f32 %v601_v4, %v570_v27  ;;  %v460_v4 = vadd.f32 %v444_v10, %v1053_v42 }
 0x112   :  { %v462_v42 = vadd.f32 %v446_v22, %v1065_v48  ;;  %v448_v48 = vmul.f32 %v1093_v13, %v1151_v50 }
 0x113   :  { %v555_v28 = vadd.f32 %v539_v59, %v455_v1  ;;  %v665_v45 = vmul.f32 %v596_v17, %v569_v16 }
 0x114   :  { %v606_v41 = vpop.permute.xlu0 %605 }
 0x115   :  { %v591_v15 = vpop.permute.xlu1 %590  ;;  %v571_v24 = vmax.f32 %v555_v28, 0.0 }
 0x116   :  { %v664_v26 = vmul.f32 %v591_v15, %v568_v21 }
 0x117   :  { %v667_v29 = vmul.f32 %v606_v41, %v571_v24 }
 0x118   :  { %v679_v8 = vadd.f32 %v664_v26, %v663_v5  ;;  %v611_v49 = vpop.permute.xlu0 %610 }
 0x11a   :  { %v680_v33 = vadd.f32 %v679_v8, %v665_v45  ;;  %v489_v57 = vpop.permute.xlu1 %488 }
 0x11b   :  { %v540_v1 = vmul.f32 %v1111_v44, %v489_v57 }
 0x11c   :  { %v681_v23 = vadd.f32 %v680_v33, %v666_v32  ;;  %v616_v55 = vpop.permute.xlu0 %615 }
 0x11d   :  { %v556_v40 = vadd.f32 %v540_v1, %v456_v0 }
 0x11e   :  { %v682_v37 = vadd.f32 %v681_v23, %v667_v29  ;;  %v493_v56 = vpop.permute.xlu1 %492 }
 0x11f   :  { %v572_v9 = vmax.f32 %v556_v40, 0.0  ;;  %v541_v60 = vmul.f32 %v1111_v44, %v493_v56 }
 0x120   :  { %v621_v11 = vpop.permute.xlu0 %620 }
 0x121   :  { %v668_v61 = vmul.f32 %v611_v49, %v572_v9  ;;  %v557_v46 = vadd.f32 %v541_v60, %v1138_v2 }
 0x122   :  { %v497_v39 = vpop.permute.xlu1 %496 }
 0x123   :  { %v683_v25 = vadd.f32 %v682_v37, %v668_v61  ;;  %v573_v63 = vmax.f32 %v557_v46, 0.0  ;;  %v542_v35 = vmul.f32 %v1111_v44, %v497_v39  ;;  %v464_v46 = vadd.f32 %v448_v48, %v1074_v54 }
 0x124   :  { %v626_v3 = vpop.permute.xlu0 %625  ;;  %v450_v39 = vmul.f32 %v1093_v13, %v1159_v36 }
 0x125   :  { %v669_v34 = vmul.f32 %v616_v55, %v573_v63  ;;  %v558_v14 = vadd.f32 %v542_v35, %v458_v19 }
 0x126   :  { %v501_v17 = vpop.permute.xlu1 %500  ;;  %v466_v50 = vadd.f32 %v450_v39, %v1079_v62  ;;  %v700_v62 = vstv %s1225_s4 }
 0x127   :  { %v684_v51 = vadd.f32 %v683_v25, %v669_v34  ;;  %v574_v18 = vmax.f32 %v558_v14, 0.0  ;;  %v543_v52 = vmul.f32 %v1111_v44, %v501_v17 }
 0x128   :  { %v631_v12 = vpop.permute.xlu0 %630 }
 0x129   :  { %v670_v6 = vmul.f32 %v621_v11, %v574_v18  ;;  %v559_v2 = vadd.f32 %v543_v52, %v1146_v47 }
 0x12a   :  { %v505_v7 = vpop.permute.xlu1 %504 }
 0x12b   :  { %v685_v59 = vadd.f32 %v684_v51, %v670_v6  ;;  %v575_v38 = vmax.f32 %v559_v2, 0.0  ;;  %v544_v16 = vmul.f32 %v1111_v44, %v505_v7 }
 0x12c   :  { %v636_v30 = vpop.permute.xlu0 %635 }
 0x12d   :  { %v671_v28 = vmul.f32 %v626_v3, %v575_v38  ;;  %v560_v41 = vadd.f32 %v544_v16, %v460_v4 }
 0x12e   :  { %v509_v21 = vpop.permute.xlu1 %508 }
 0x12f   :  { %v686_v15 = vadd.f32 %v685_v59, %v671_v28  ;;  %v576_v5 = vmax.f32 %v560_v41, 0.0  ;;  %v545_v26 = vmul.f32 %v1111_v44, %v509_v21 }
 0x130   :  { %v641_v57 = vpop.permute.xlu0 %640 }
 0x131   :  { %v672_v47 = vmul.f32 %v631_v12, %v576_v5  ;;  %v561_v45 = vadd.f32 %v545_v26, %v1154_v53 }
 0x132   :  { %v513_v27 = vpop.permute.xlu1 %512 }
 0x133   :  { %v687_v24 = vadd.f32 %v686_v15, %v672_v47  ;;  %v577_v8 = vmax.f32 %v561_v45, 0.0  ;;  %v546_v49 = vmul.f32 %v1111_v44, %v513_v27 }
 0x134   :  { %v646_v56 = vpop.permute.xlu0 %645 }
 0x135   :  { %v673_v32 = vmul.f32 %v636_v30, %v577_v8  ;;  %v562_v33 = vadd.f32 %v546_v49, %v462_v42 }
 0x136   :  { %v517_v0 = vpop.permute.xlu1 %516 }
 0x137   :  { %v688_v43 = vadd.f32 %v687_v24, %v673_v32  ;;  %v578_v1 = vmax.f32 %v562_v33, 0.0  ;;  %v547_v29 = vmul.f32 %v1111_v44, %v517_v0 }
 0x138   :  { %v656_v10 = vpop.permute.xlu0 %655 }
 0x139   :  { %v674_v23 = vmul.f32 %v641_v57, %v578_v1  ;;  %v563_v55 = vadd.f32 %v547_v29, %v1165_v31 }
 0x13a   :  { %v521_v40 = vpop.permute.xlu1 %520 }
 0x13b   :  { %v579_v53 = vmax.f32 %v563_v55, 0.0  ;;  %v689_v37 = vadd.f32 %v688_v43, %v674_v23  ;;  %v548_v9 = vmul.f32 %v1111_v44, %v521_v40 }
 0x13d   :  { %v675_v58 = vmul.f32 %v646_v56, %v579_v53  ;;  %v564_v31 = vadd.f32 %v548_v9, %v464_v46 }
 0x13e   :  { %v525_v60 = vpop.permute.xlu1 %524 }
 0x13f   :  { %v549_v11 = vmul.f32 %v1111_v44, %v525_v60  ;;  %v690_v61 = vadd.f32 %v689_v37, %v675_v58  ;;  %v580_v34 = vmax.f32 %v564_v31, 0.0 }
 0x141   :  { %v565_v19 = vadd.f32 %v549_v11, %v1171_v20 }
 0x142   :  { %v529_v25 = vpop.permute.xlu1 %528 }
 0x143   :  { %v550_v63 = vmul.f32 %v1111_v44, %v529_v25  ;;  %v581_v35 = vmax.f32 %v565_v19, 0.0 }
 0x145   :  { %v566_v3 = vadd.f32 %v550_v63, %v466_v50  ;;  %v677_v51 = vmul.f32 %v656_v10, %v581_v35 }
 0x147   :  { %v651_v14 = vpop.permute.xlu1 %650  ;;  %v582_v54 = vmax.f32 %v566_v3, 0.0 }
 0x148   :  { %v676_v17 = vmul.f32 %v651_v14, %v580_v34 }
 0x14a   :  { %v691_v18 = vadd.f32 %v690_v61, %v676_v17 }
 0x14b   :  { %v661_v52 = vpop.permute.xlu1 %660 }
 0x14c   :  { %v678_v6 = vmul.f32 %v661_v52, %v582_v54  ;;  %v692_v13 = vadd.f32 %v691_v18, %v677_v51 }
 0x14e   :  { %v693_v36 = vadd.f32 %v692_v13, %v678_v6 }
 0x150   :  { %v694_v2 = vrot.slane %v693_v36, 4 }
 0x152   :  { %v695_v20 = vadd.f32 %v694_v2, %v693_v36 }
 0x154   :  { %v696_v12 = vrot.slane %v695_v20, 2 }
 0x156   :  { %v697_v7 = vadd.f32 %v696_v12, %v695_v20 }
 0x158   :  { %v698_v44 = vrot.slane %v697_v7, 1 }
 0x15a   :  { %v699_v4 = vadd.f32 %v698_v44, %v697_v7 }
 0x15c   :  { %v701_v59 = vadd.f32 %v700_v62, %v699_v4 }
 0x15e   :  { %702 = vst [vmem:[%s1226_s5] sm:$0x1] %v701_v59 }

</bundles_post_ra>
